<compile_context>
chip_gen: v6e
topology: v6e:2x2x1
jax: 0.10.0
libtpu: 0.0.40
codegen_flags: <defaults>
</compile_context>

<pallas_src>
from functools import partial

import jax
import jax.numpy as jnp
from jax.experimental import pallas as pl
from jax.experimental.pallas import tpu as pltpu

EPS = 1e-5


# --------------------------------------------------------------------------
# Kernel 1: ConvTranspose2d(C1, C1, kernel=2, stride=2) as 4 tap matmuls.
# --------------------------------------------------------------------------
def upsample_kernel(x1_ref, wu_ref, bu_ref, o_ref):
    """x1_ref: (1, C1, Min); wu_ref: (4, C1, C1) [k=kh*2+kw, cout, cin];
    bu_ref: (C1, 1); o_ref: (1, 4, C1, Min)."""
    x = x1_ref[0]                      # (C1, Min)
    bu = bu_ref[...]                   # (C1, 1)
    taps = [jnp.dot(wu_ref[k], x, preferred_element_type=jnp.float32) + bu
            for k in range(4)]
    o_ref[...] = jnp.stack(taps, axis=0)[None].astype(o_ref.dtype)


# --------------------------------------------------------------------------
# Kernel 2: double_conv = (conv3x3 -> BN(train stats) -> ReLU) x 2
# operating on flattened (C, M=H*W) activations.
# --------------------------------------------------------------------------
def _conv3x3_flat(act, wmat, mask_l, mask_r, width, m_flat):
    """3x3 SAME conv on a row-major flattened activation.

    act: (Cin, M) f32, wmat: (Cout, 9*Cin) f32, masks: (1, M) f32.
    Returns (Cout, M) f32 (no bias -- it cancels under training-mode BN).
    """
    cin = act.shape[0]
    zpad = jnp.zeros((cin, width + 1), jnp.float32)
    padded = jnp.concatenate([zpad, act, zpad], axis=1)   # (Cin, M + 2W + 2)
    taps = []
    for kh in range(3):
        for kw in range(3):
            start = kh * width + kw                       # == (dh*W+dw) + (W+1)
            t = padded[:, start:start + m_flat]
            if kw == 0:                                   # dw = -1: zero at w == 0
                t = t * mask_l
            elif kw == 2:                                 # dw = +1: zero at w == W-1
                t = t * mask_r
            taps.append(t)
    slab = jnp.concatenate(taps, axis=0)                  # (9*Cin, M) im2col slab
    return jnp.dot(wmat, slab, preferred_element_type=jnp.float32)


def _bn_relu(ys, gamma, beta, count):
    """Training-mode BatchNorm (biased var over all samples/pixels) + ReLU,
    folded into a single per-channel scale/shift.  ys: list of (C, M)."""
    total = ys[0]
    for y in ys[1:]:
        total = total + y
    mean = jnp.sum(total, axis=1, keepdims=True) / count          # (C, 1)
    sq = None
    for y in ys:
        d = y - mean
        sq = d * d if sq is None else sq + d * d
    var = jnp.sum(sq, axis=1, keepdims=True) / count               # (C, 1)
    scale = gamma * jax.lax.rsqrt(var + EPS)
    shift = beta - scale * mean
    return [jnp.maximum(y * scale + shift, 0.0) for y in ys]


def double_conv_kernel(x_ref, ml_ref, mr_ref, w1_ref, g1_ref, be1_ref,
                       w2_ref, g2_ref, be2_ref, o_ref, *, batch, width, m_flat):
    mask_l = ml_ref[...]                       # (1, M)
    mask_r = mr_ref[...]                       # (1, M)
    w1 = w1_ref[...]                           # (Cout, 9*Cin)
    w2 = w2_ref[...]                           # (Cout, 9*Cout)
    count = float(batch * m_flat)

    ys = [_conv3x3_flat(x_ref[n], w1, mask_l, mask_r, width, m_flat)
          for n in range(batch)]
    hs = _bn_relu(ys, g1_ref[...], be1_ref[...], count)
    ys2 = [_conv3x3_flat(hs[n], w2, mask_l, mask_r, width, m_flat)
           for n in range(batch)]
    outs = _bn_relu(ys2, g2_ref[...], be2_ref[...], count)

    o_ref[...] = jnp.stack(outs, axis=0).astype(o_ref.dtype)       # (N, Cout, M)


# --------------------------------------------------------------------------
# Wrapper
# --------------------------------------------------------------------------
def up_forward(x1, x2, params):
    """x1: (N, in_ch//2, Hin, Win), x2: (N, in_ch//2, H, W) -> (N, out_ch, H, W)."""
    n, c1, hin, win = x1.shape
    n2, c2, h, w = x2.shape
    assert n2 == n and c2 == c1
    m_in = hin * win
    m = h * w
    cin = 2 * c1
    cout = params["w1"].shape[0]

    # ---- parameter packing (one-time layout plumbing in XLA) ----
    # ConvTranspose2d weight (in, out, kH, kW) -> (k=kh*2+kw, out, in)
    wu_p = jnp.transpose(params["wu"], (2, 3, 1, 0)).reshape(4, c1, c1)
    bu_c = params["bu"].reshape(c1, 1)
    # Conv2d weight (out, in, kh, kw) -> (out, (kh*3+kw)*Cin + in)  (matches slab order)
    w1_p = jnp.transpose(params["w1"], (0, 2, 3, 1)).reshape(cout, 9 * cin)
    w2_p = jnp.transpose(params["w2"], (0, 2, 3, 1)).reshape(cout, 9 * cout)
    g1 = params["g1"].reshape(cout, 1)
    be1 = params["be1"].reshape(cout, 1)
    g2 = params["g2"].reshape(cout, 1)
    be2 = params["be2"].reshape(cout, 1)
    # Conv biases b1/b2 cancel exactly inside training-mode BatchNorm -> not passed.

    # ---- kernel 1: ConvTranspose2d taps (batch-parallel grid) ----
    x1f = x1.reshape(n, c1, m_in).astype(jnp.float32)
    taps = pl.pallas_call(
        upsample_kernel,
        out_shape=jax.ShapeDtypeStruct((n, 4, c1, m_in), jnp.float32),
        grid=(n,),
        in_specs=[
            pl.BlockSpec((1, c1, m_in), lambda i: (i, 0, 0)),
            pl.BlockSpec((4, c1, c1), lambda i: (0, 0, 0)),
            pl.BlockSpec((c1, 1), lambda i: (0, 0)),
        ],
        out_specs=pl.BlockSpec((1, 4, c1, m_in), lambda i: (i, 0, 0, 0)),
        compiler_params=pltpu.CompilerParams(dimension_semantics=("parallel",)),
    )(x1f, wu_p, bu_c)

    # ---- glue: interleave taps to the upsampled image, F.pad, channel concat ----
    u = taps.reshape(n, 2, 2, c1, hin, win)                 # (n, kh, kw, c, h, w)
    u = jnp.transpose(u, (0, 3, 4, 1, 5, 2)).reshape(n, c1, 2 * hin, 2 * win)
    dy = h - 2 * hin
    dx = w - 2 * win
    u = jnp.pad(u, ((0, 0), (0, 0),
                    (dy // 2, dy - dy // 2), (dx // 2, dx - dx // 2)))
    xin = jnp.concatenate([x2.astype(jnp.float32), u], axis=1).reshape(n, cin, m)

    # Column-boundary masks for the flattened 3x3 conv (built once on host side).
    col = jnp.arange(m, dtype=jnp.int32) % w
    mask_l = (col != 0).astype(jnp.float32).reshape(1, m)
    mask_r = (col != w - 1).astype(jnp.float32).reshape(1, m)

    # ---- kernel 2: double_conv (single shot: BN needs global batch statistics) ----
    out_flat = pl.pallas_call(
        partial(double_conv_kernel, batch=n, width=w, m_flat=m),
        out_shape=jax.ShapeDtypeStruct((n, cout, m), jnp.float32),
        grid=(1,),
        in_specs=[
            pl.BlockSpec((n, cin, m), lambda i: (0, 0, 0)),
            pl.BlockSpec((1, m), lambda i: (0, 0)),
            pl.BlockSpec((1, m), lambda i: (0, 0)),
            pl.BlockSpec((cout, 9 * cin), lambda i: (0, 0)),
            pl.BlockSpec((cout, 1), lambda i: (0, 0)),
            pl.BlockSpec((cout, 1), lambda i: (0, 0)),
            pl.BlockSpec((cout, 9 * cout), lambda i: (0, 0)),
            pl.BlockSpec((cout, 1), lambda i: (0, 0)),
            pl.BlockSpec((cout, 1), lambda i: (0, 0)),
        ],
        out_specs=pl.BlockSpec((n, cout, m), lambda i: (0, 0, 0)),
        compiler_params=pltpu.CompilerParams(dimension_semantics=("arbitrary",)),
    )(xin, mask_l, mask_r, w1_p, g1, be1, w2_p, g2, be2)

    return out_flat.reshape(n, cout, h, w)


# --------------------------------------------------------------------------
# Pure-JAX reference of the PyTorch forward (training-mode BN).
# --------------------------------------------------------------------------
def ref_up(x1, x2, p):
    hi = jax.lax.Precision.HIGHEST
    n, c1, hin, win = x1.shape
    _, _, h, w = x2.shape

    # ConvTranspose2d(C1, C1, 2, stride=2): out[n,o,2h+k,2w+l] = sum_i x[n,i,h,w]*W[i,o,k,l] + b[o]
    t = jnp.einsum("nihw,iokl->nohkwl", x1, p["wu"], precision=hi)
    u = t.reshape(n, c1, 2 * hin, 2 * win) + p["bu"].reshape(1, -1, 1, 1)
    dy = h - 2 * hin
    dx = w - 2 * win
    u = jnp.pad(u, ((0, 0), (0, 0),
                    (dy // 2, dy - dy // 2), (dx // 2, dx - dx // 2)))
    x = jnp.concatenate([x2, u], axis=1)

    def conv_bn_relu(hcur, wgt, b, g, be):
        y = jax.lax.conv_general_dilated(
            hcur, wgt, (1, 1), "SAME",
            dimension_numbers=("NCHW", "OIHW", "NCHW"), precision=hi)
        y = y + b.reshape(1, -1, 1, 1)
        mean = jnp.mean(y, axis=(0, 2, 3), keepdims=True)
        var = jnp.mean((y - mean) ** 2, axis=(0, 2, 3), keepdims=True)
        yn = g.reshape(1, -1, 1, 1) * (y - mean) / jnp.sqrt(var + EPS) \
            + be.reshape(1, -1, 1, 1)
        return jnp.maximum(yn, 0.0)

    x = conv_bn_relu(x, p["w1"], p["b1"], p["g1"], p["be1"])
    x = conv_bn_relu(x, p["w2"], p["b2"], p["g2"], p["be2"])
    return x


if __name__ == "__main__":
    # up(in_ch=8, out_ch=8): x1 (2,4,8,8), x2 (2,4,16,16) -> (2,8,16,16)
    IN_CH, OUT_CH = 8, 8
    N = 2
    C1 = IN_CH // 2
    HIN, WIN = 8, 8
    H, W = 2 * HIN, 2 * WIN

    key = jax.random.PRNGKey(0)
    ks = jax.random.split(key, 12)
    x1 = jax.random.normal(ks[0], (N, C1, HIN, WIN), jnp.float32)
    x2 = jax.random.normal(ks[1], (N, C1, H, W), jnp.float32)

    params = {
        # ConvTranspose2d(C1, C1, 2, stride=2): weight (in, out, kH, kW)
        "wu": 0.1 * jax.random.normal(ks[2], (C1, C1, 2, 2), jnp.float32),
        "bu": 0.1 * jax.random.normal(ks[3], (C1,), jnp.float32),
        # double_conv(IN_CH, OUT_CH): Conv2d weights (out, in, 3, 3), PyTorch layout
        "w1": 0.1 * jax.random.normal(ks[4], (OUT_CH, IN_CH, 3, 3), jnp.float32),
        "b1": 0.1 * jax.random.normal(ks[5], (OUT_CH,), jnp.float32),
        "g1": 1.0 + 0.1 * jax.random.normal(ks[6], (OUT_CH,), jnp.float32),
        "be1": 0.1 * jax.random.normal(ks[7], (OUT_CH,), jnp.float32),
        "w2": 0.1 * jax.random.normal(ks[8], (OUT_CH, OUT_CH, 3, 3), jnp.float32),
        "b2": 0.1 * jax.random.normal(ks[9], (OUT_CH,), jnp.float32),
        "g2": 1.0 + 0.1 * jax.random.normal(ks[10], (OUT_CH,), jnp.float32),
        "be2": 0.1 * jax.random.normal(ks[11], (OUT_CH,), jnp.float32),
    }

    out = jax.block_until_ready(up_forward(x1, x2, params))
    ref = jax.block_until_ready(ref_up(x1, x2, params))

    assert out.shape == (N, OUT_CH, H, W), out.shape
    assert jnp.allclose(out, ref, atol=2e-4, rtol=2e-4), \
        float(jnp.max(jnp.abs(out - ref)))

    print("KERNEL_OK")
</pallas_src>

<mosaic_0001>
module attributes {stable_mosaic.version = 11 : i64} {
  func.func @upsample_kernel(%arg0: i32, %arg1: memref<1x4x64xf32, #tpu.memory_space<vmem>>, %arg2: memref<4x4x4xf32, #tpu.memory_space<vmem>>, %arg3: memref<4x1xf32, #tpu.memory_space<vmem>>, %arg4: memref<1x4x4x64xf32, #tpu.memory_space<vmem>>) attributes {dimension_semantics = [#tpu.dimension_semantics<parallel>], iteration_bounds = array<i64: 2>, scalar_prefetch = 0 : i64, scratch_operands = 0 : i64, tpu.core_type = #tpu.core_type<tc>, window_params = [{transform_indices = @transform_0, window_bounds = array<i64: 1, 4, 64>}, {pipeline_mode = #tpu.pipeline_mode<synchronous>, transform_indices = @transform_1, window_bounds = array<i64: 4, 4, 4>}, {pipeline_mode = #tpu.pipeline_mode<synchronous>, transform_indices = @transform_2, window_bounds = array<i64: 4, 1>}, {transform_indices = @transform_3, window_bounds = array<i64: 1, 4, 4, 64>}]} {
    %c0 = arith.constant 0 : index
    %c0_0 = arith.constant 0 : index
    %c0_1 = arith.constant 0 : index
    %0 = vector.load %arg1[%c0, %c0_0, %c0_1] : memref<1x4x64xf32, #tpu.memory_space<vmem>>, vector<1x4x64xf32>
    %1 = vector.shape_cast %0 : vector<1x4x64xf32> to vector<4x64xf32>
    %c0_2 = arith.constant 0 : index
    %c0_3 = arith.constant 0 : index
    %2 = vector.load %arg3[%c0_2, %c0_3] : memref<4x1xf32, #tpu.memory_space<vmem>>, vector<4x1xf32>
    %c0_4 = arith.constant 0 : index
    %c0_5 = arith.constant 0 : index
    %c0_6 = arith.constant 0 : index
    %3 = vector.load %arg2[%c0_4, %c0_5, %c0_6] : memref<4x4x4xf32, #tpu.memory_space<vmem>>, vector<1x4x4xf32>
    %4 = vector.shape_cast %3 : vector<1x4x4xf32> to vector<4x4xf32>
    %cst = arith.constant dense<0.000000e+00> : vector<4x64xf32>
    %5 = tpu.matmul %4, %1, %cst {dimension_numbers = #tpu.dot_dimension_numbers<[1], [0], [0], [1], [0, 0, 1, 1], [], []>} : vector<4x4xf32>, vector<4x64xf32>, vector<4x64xf32> -> vector<4x64xf32>
    %6 = vector.broadcast %2 : vector<4x1xf32> to vector<4x64xf32>
    %7 = arith.addf %5, %6 : vector<4x64xf32>
    %c1 = arith.constant 1 : index
    %c0_7 = arith.constant 0 : index
    %c0_8 = arith.constant 0 : index
    %8 = vector.load %arg2[%c1, %c0_7, %c0_8] : memref<4x4x4xf32, #tpu.memory_space<vmem>>, vector<1x4x4xf32>
    %9 = vector.shape_cast %8 : vector<1x4x4xf32> to vector<4x4xf32>
    %cst_9 = arith.constant dense<0.000000e+00> : vector<4x64xf32>
    %10 = tpu.matmul %9, %1, %cst_9 {dimension_numbers = #tpu.dot_dimension_numbers<[1], [0], [0], [1], [0, 0, 1, 1], [], []>} : vector<4x4xf32>, vector<4x64xf32>, vector<4x64xf32> -> vector<4x64xf32>
    %11 = vector.broadcast %2 : vector<4x1xf32> to vector<4x64xf32>
    %12 = arith.addf %10, %11 : vector<4x64xf32>
    %c2 = arith.constant 2 : index
    %c0_10 = arith.constant 0 : index
    %c0_11 = arith.constant 0 : index
    %13 = vector.load %arg2[%c2, %c0_10, %c0_11] : memref<4x4x4xf32, #tpu.memory_space<vmem>>, vector<1x4x4xf32>
    %14 = vector.shape_cast %13 : vector<1x4x4xf32> to vector<4x4xf32>
    %cst_12 = arith.constant dense<0.000000e+00> : vector<4x64xf32>
    %15 = tpu.matmul %14, %1, %cst_12 {dimension_numbers = #tpu.dot_dimension_numbers<[1], [0], [0], [1], [0, 0, 1, 1], [], []>} : vector<4x4xf32>, vector<4x64xf32>, vector<4x64xf32> -> vector<4x64xf32>
    %16 = vector.broadcast %2 : vector<4x1xf32> to vector<4x64xf32>
    %17 = arith.addf %15, %16 : vector<4x64xf32>
    %c3 = arith.constant 3 : index
    %c0_13 = arith.constant 0 : index
    %c0_14 = arith.constant 0 : index
    %18 = vector.load %arg2[%c3, %c0_13, %c0_14] : memref<4x4x4xf32, #tpu.memory_space<vmem>>, vector<1x4x4xf32>
    %19 = vector.shape_cast %18 : vector<1x4x4xf32> to vector<4x4xf32>
    %cst_15 = arith.constant dense<0.000000e+00> : vector<4x64xf32>
    %20 = tpu.matmul %19, %1, %cst_15 {dimension_numbers = #tpu.dot_dimension_numbers<[1], [0], [0], [1], [0, 0, 1, 1], [], []>} : vector<4x4xf32>, vector<4x64xf32>, vector<4x64xf32> -> vector<4x64xf32>
    %21 = vector.broadcast %2 : vector<4x1xf32> to vector<4x64xf32>
    %22 = arith.addf %20, %21 : vector<4x64xf32>
    %23 = vector.shape_cast %7 : vector<4x64xf32> to vector<1x4x64xf32>
    %24 = vector.shape_cast %12 : vector<4x64xf32> to vector<1x4x64xf32>
    %25 = vector.shape_cast %17 : vector<4x64xf32> to vector<1x4x64xf32>
    %26 = vector.shape_cast %22 : vector<4x64xf32> to vector<1x4x64xf32>
    %27 = tpu.concatenate %23, %24, %25, %26 in 0 : vector<1x4x64xf32>, vector<1x4x64xf32>, vector<1x4x64xf32>, vector<1x4x64xf32> -> vector<4x4x64xf32>
    %28 = vector.shape_cast %27 : vector<4x4x64xf32> to vector<1x4x4x64xf32>
    %c0_16 = arith.constant 0 : index
    %c0_17 = arith.constant 0 : index
    %c0_18 = arith.constant 0 : index
    %c0_19 = arith.constant 0 : index
    %29 = vector.load %arg4[%c0_16, %c0_17, %c0_18, %c0_19] : memref<1x4x4x64xf32, #tpu.memory_space<vmem>>, vector<1x4x4x64xf32>
    tpu.vector_store %arg4[%c0_16, %c0_17, %c0_18, %c0_19], %28 {strides = array<i32>} : memref<1x4x4x64xf32, #tpu.memory_space<vmem>>, vector<1x4x4x64xf32>,
    return
  }
  func.func @transform_0(%arg0: i32) -> (i32, i32, i32) {
    %c0_i32 = arith.constant 0 : i32
    %c0_i32_0 = arith.constant 0 : i32
    %c0_i32_1 = arith.constant 0 : i32
    return %arg0, %c0_i32, %c0_i32_0 : i32, i32, i32
  }
  func.func @transform_1(%arg0: i32) -> (i32, i32, i32) {
    %c0_i32 = arith.constant 0 : i32
    %c0_i32_0 = arith.constant 0 : i32
    %c0_i32_1 = arith.constant 0 : i32
    %c0_i32_2 = arith.constant 0 : i32
    return %c0_i32, %c0_i32_0, %c0_i32_1 : i32, i32, i32
  }
  func.func @transform_2(%arg0: i32) -> (i32, i32) {
    %c0_i32 = arith.constant 0 : i32
    %c0_i32_0 = arith.constant 0 : i32
    %c0_i32_1 = arith.constant 0 : i32
    return %c0_i32, %c0_i32_0 : i32, i32
  }
  func.func @transform_3(%arg0: i32) -> (i32, i32, i32, i32) {
    %c0_i32 = arith.constant 0 : i32
    %c0_i32_0 = arith.constant 0 : i32
    %c0_i32_1 = arith.constant 0 : i32
    %c0_i32_2 = arith.constant 0 : i32
    return %arg0, %c0_i32, %c0_i32_0, %c0_i32_1 : i32, i32, i32, i32
  }
}

</mosaic_0001>

<bundles_post_ra>
// kernel: tpu_custom_call.1
= control target key start
LH: loop header
LB: loop body
LE: loop exit
PB: predicated region body
PF: predicated region fallthrough
CT: control target
= control target key end

     0   :  { %8 = vsyncpa [#allocation3], 0  ;;  %s1069_s0 = inlined_call_operand.hbm [shape: f32[2,4,64], index: 0, kind: input, shape index: {}]   ;;  %s1070_s1 = inlined_call_operand.hbm [shape: f32[4,4,4], index: 1, kind: input, shape index: {}]   ;;  %s1071_s2 = inlined_call_operand.vmem [shape: f32[4,1], index: 2, kind: input, shape index: {}]   ;;  %s1072_s3 = inlined_call_operand.hbm [shape: f32[2,4,4,64], index: 3, kind: output, shape index: {}]  }
   0x1   :  { %10 = vsyncpa [#allocation3 + $0x1], 0 }
   0x2   :  { %11 = vsyncpa [#allocation6], 0 }
   0x3   :  { %12 = vsyncpa [#allocation4], 0 }
   0x4   :  { %14 = vsyncpa [#allocation4 + $0x1], 0  ;;  %s885_s12 = smov 0   ;;  %s887_s13 = smov 0  }
   0x5   :  { %s889_s14 = smov 0   ;;  %s891_s15 = smov 0  }
   0x6 LB: > { %s906_s16 = sadd.s32 4294967295, %s853_s15   ;;  %s614_s17 = sadd.s32 4294967294, %s853_s15   ;;  %s853_s15 = sphi %s891_s15, %s1094_s15   ;;  %s849_s14 = sphi %s889_s14, %s1093_s14   ;;  %s845_s13 = sphi %s887_s13, %s1092_s13   ;;  %s841_s12 = sphi %s885_s12, %s1091_s12  }
   0x7   : > { %p40_p0 = scmp.ne.s32.totalorder %s845_s13, %s841_s12  ;;  %p1073_p1 = scmp.eq.s32.totalorder %s906_s16, 0 }
   0x8   : > { %p112_p3 = scmp.eq.s32.totalorder %s614_s17, 1  ;;  %p615_p5 = scmp.ge.s32.totalorder %s853_s15, 1 }
   0x9   : > { %p915_p4 = por %p1073_p1, %p40_p0  ;;  %p119_p7 = scmp.lt.s32.totalorder %s853_s15, 3 }
   0xa   : > { %p920_p6 = por %p112_p3, %p40_p0  ;;  %s855_s21 = smov [#allocation5]  }
   0xb   : > { %s1077_s18 = scalar_select %p915_p4, 1, 0 }
   0xc   : > { %s1078_s19 = scalar_select %p920_p6, 1, 0 }
   0xd   : > { %p925_p8 = pnand %p615_p5, %p119_p7  ;;  %s131_s22 = sshll.u32 %s855_s21, 4  ;;  %s132_s22 = int_to_ptr.vmem [resolvable:$true] %s131_s22 }
   0xe   : > { %s939_s24 = sadd.s32 1, %s853_s15   ;;  %s27_s25 = sadd.s32 1, %s849_s14 }
   0xf   : > { %s1079_s20 = scalar_select %p925_p8, 1, 0 }
  0x10   : > { %p674_p9 = pneg %p925_p8  ;;  %s24_s26 = ssub.s32 %s853_s15, %s939_s24 }
  0x11   : > { %s742_s27 = scalar_lea.vmem %s132_s22, 256  ;;  %p750_p5 = scmp.lt.s32.totalorder %s132_s22, %s132_s22 }
  0x12   : > { %p934_p11 = pnand %p674_p9, %p1073_p1  ;;  %p743_p13 = scmp.ne.s32.totalorder %s132_s22, %s742_s27 }
  0x13   : > { %p751_p7 = scmp.lt.s32.totalorder %s742_s27, %s742_s27 }
  0x14   : > { %p733_p12 = pneg %p934_p11 }
  0x15   : > { %p752_p10 = por %p751_p7, %p750_p5 }
  0x16   : > { %p745_p0 = pnand %p743_p13, %p733_p12 }
  0x18   : > { %p746_p3 = pneg %p745_p0 }
  0x1a   : > { %p753_p2 = pnand %p752_p10, %p746_p3 }
  0x1c   : > { %756 = shalt.err (!%p753_p2)
}
  0x1d   : > { %s856_s28 = smov 64   ;;  %s857_s29 = smov 4  }
  0x1e   : > { %677 = dma.hbm_to_vmem [thread:$0]  (!%p934_p11), %s1070_s1, 256, %s132_s22, [#allocation6], %s856_s28, %s856_s28, %s857_s29  }
  0x1f   : > { %p25_p9 = scmp.eq.s32.totalorder %s24_s26, 0  ;;  %p34_p12 = scmp.ne.s32.totalorder %s849_s14, %s845_s13 }
  0x20   : > { %p35_p10 = scmp.eq.s32.totalorder %s853_s15, 0  ;;  %p687_p2 = scmp.lt.s32.totalorder %s853_s15, 2 }
  0x21   : > { %s956_s5 = scalar_select %p25_p9, %s849_s14, %s27_s25  }
  0x22   : > { %p36_p13 = por %p35_p10, %p34_p12  ;;  %p1081_p0 = scmp.eq.s32.totalorder %s906_s16, 1 }
  0x23   : > { %s148_s7 = sand.u32 1, %s849_s14   ;;  %s619_s8 = sshll.u32 %s853_s15, 6 }
  0x24   : > { %p960_p3 = por %p1081_p0, %p34_p12  ;;  %s618_s9 = sshll.u32 %s148_s7, 2 }
  0x25   : > { %s969_s17 = scalar_lea.hbm %s1069_s0, %s619_s8  ;;  %s152_s21 = scalar_lea.vmem [#allocation2], %s618_s9 }
  0x26   : > { %s1082_s6 = scalar_select %p960_p3, 1, 0 }
  0x27   : > { %s159_s22 = sshll.u32 %s152_s21, 4  ;;  %p971_p11 = pnand %p687_p2, %p36_p13  ;;  %s160_s22 = int_to_ptr.vmem [resolvable:$true] %s159_s22 }
  0x28   : > { %s149_s25 = scalar_lea.sflag [#allocation3], %s148_s7  ;;  %s757_s26 = scalar_lea.hbm %s969_s17, 64 }
  0x29   : > { %p758_p5 = scmp.ne.s32.totalorder %s969_s17, %s757_s26  ;;  %p759_p7 = pneg %p971_p11 }
  0x2a   : > { %s762_s29 = scalar_lea.hbm %s1069_s0, 128  ;;  %p763_p10 = scmp.lt.s32.totalorder %s969_s17, %s1069_s0 }
  0x2b   : > { %p760_p9 = pnand %p759_p7, %p758_p5  ;;  %p764_p2 = scmp.lt.s32.totalorder %s762_s29, %s757_s26 }
  0x2d   : > { %p761_p12 = pneg %p760_p9  ;;  %p765_p13 = por %p764_p2, %p763_p10 }
  0x2f   : > { %p766_p0 = pnand %p765_p13, %p761_p12 }
  0x31   : > { %769 = shalt.err (!%p766_p0)
}
  0x32   : > { %s770_s8 = scalar_lea.vmem %s160_s22, 64  ;;  %s858_s7 = smov [#allocation2]  }
  0x33   : > { %p771_p1 = scmp.ne.s32.totalorder %s160_s22, %s770_s8  ;;  %s775_s9 = sshll.u32 %s858_s7, 4  ;;  %s776_s9 = int_to_ptr.vmem [resolvable:$false] %s775_s9 }
  0x34   : > { %s777_s10 = scalar_lea.vmem %s776_s9, 128  ;;  %p778_p5 = scmp.lt.s32.totalorder %s160_s22, %s776_s9 }
  0x35   : > { %p773_p6 = pnand %p771_p1, %p759_p7  ;;  %p779_p9 = scmp.lt.s32.totalorder %s777_s10, %s770_s8 }
  0x37   : > { %p774_p3 = pneg %p773_p6  ;;  %p780_p4 = por %p779_p9, %p778_p5 }
  0x39   : > { %p781_p8 = pnand %p780_p4, %p774_p3 }
  0x3b   : > { %784 = shalt.err (!%p781_p8)
}
  0x3c   : > { %681 = dma.hbm_to_vmem [thread:$0]  (!%p971_p11), %s969_s17, 64, %s160_s22, %s149_s25  }
  0x3d   : > { %p1084_p12 = scmp.ne.s32.totalorder %s1079_s20, 0 }
  0x3e   : > { %s992_s11 = sand.u32 (!%p1084_p12), 1, %s845_s13   ;;  %p1085_p1 = scmp.ne.s32.totalorder (!%p1084_p12), %s1077_s18, 0 }
  0x3f   : > { %168 = sbr.rel (%p1084_p12) target bundleno = 290 (0x122), region = 32  ;;  %s621_s21 = sshll.u32 (!%p1084_p12), %s992_s11, 2 }
  0x40   : > { %s171_s26 = scalar_lea.sflag (!%p1084_p12), [#allocation3], %s992_s11  ;;  %s174_s27 = scalar_lea.vmem (!%p1084_p12), [#allocation2], %s621_s21 }
  0x44   : > { %828 = dma.done.wait (%p1085_p1), %s171_s26, 64  }
  0x45   : > { %830 = vsyncadd (%p1085_p1), %s171_s26, 4294967232  ;;  %p1086_p4 = scmp.eq.s32.totalorder %s906_s16, 0 }
  0x47   : > { %832 = dma.done.wait (%p1086_p4), [#allocation6], 256   ;;  %p1087_p6 = pmov %p1086_p4 }
  0x48   : > { %v859_v0 = vmov 0.0   ;;  %vm860_vm0 = vmmov 0   ;;  %v861_v1 = vmov 0   ;;  %vm213_vm1 = vcmask 1043456   ;;  %v201_v2 = vld [vmem:[%s174_s27] sm:$0xf] }
  0x49   : > { %834 = vsyncadd (%p1087_p6), [#allocation6], 4294967040  ;;  %646 = vmatprep.subr.mxu0 %v859_v0  ;;  %651 = vmatprep.subr.mxu1 %v859_v0  ;;  %vm209_vm2 = vcmask 31744   ;;  %v203_v3 = vld [vmem:[#allocation5] sm:$0xf]  ;;  %s623_s17 = sshll.u32 %s992_s11, 4 }
  0x4a   : > { %648 = vmatprep.mubr.msk.f32.mxu0 %vm860_vm0, %v859_v0  ;;  %653 = vmatprep.mubr.msk.f32.mxu1 %vm860_vm0, %v859_v0  ;;  %v288_v4 = vld [vmem:[#allocation5 + $0x4] sm:$0xf]  ;;  %v363_v5 = vld [vmem:[#allocation5 + $0x8] sm:$0xf]  ;;  %v438_v6 = vld [vmem:[#allocation5 + $0xc] sm:$0xf] }
  0x4b   : > { %730 = vset.pattern.permute.xlu0 %v861_v1  ;;  %647 = vmatpush3.msk.msra.mxu0 %vm213_vm1, %v201_v2  ;;  %v202_v7 = vld [vmem:[%s1071_s2] sm:$0xf]  ;;  %vm512_vm3 = vcmask 519168   ;;  %s200_s22 = scalar_lea.vmem [#allocation7], %s623_s17  ;;  %s637_s25 = sshll.u32 %s906_s16, 8 }
  0x4c   : > { %652 = vmatpush3.msk.msra.mxu1 %vm213_vm1, %v201_v2  ;;  %649 = vmatmul.mubr.msk.f32.vlgmr.msra.gmra.mxu0 %vm209_vm2, %v203_v3  ;;  %s531_s23 = sshll.u32 %s200_s22, 4  ;;  %s1024_s30 = scalar_lea.hbm %s1072_s3, %s637_s25  ;;  %s1017_s23 = int_to_ptr.vmem [resolvable:$true] %s531_s23 }
  0x4d   : > { %654 = vmatmul.mubr.msk.f32.vlgmr.msra.gmra.mxu1 %vm209_vm2, %v288_v4  ;;  %656 = vmatprep.subr.mxu0 %v859_v0  ;;  %s518_s16 = scalar_lea.sflag [#allocation4], %s992_s11  ;;  %s785_s4 = scalar_lea.vmem %s1017_s23, 256 }
  0x4e   : > { %661 = vmatprep.subr.mxu1 %v859_v0  ;;  %657 = vmatpush3.msk.msra.mxu0 %vm213_vm1, %v201_v2  ;;  %p786_p8 = scmp.ne.s32.totalorder %s1017_s23, %s785_s4  ;;  %p1088_p3 = scmp.ne.s32.totalorder %s1082_s6, 0 }
  0x4f   : > { %662 = vmatpush3.msk.msra.mxu1 %vm213_vm1, %v201_v2  ;;  %658 = vmatprep.mubr.msk.f32.mxu0 %vm860_vm0, %v859_v0  ;;  %s862_s8 = smov [#allocation7]  }
  0x50   : > { %663 = vmatprep.mubr.msk.f32.mxu1 %vm860_vm0, %v859_v0  ;;  %659 = vmatmul.mubr.msk.f32.vlgmr.msra.gmra.mxu0 %vm209_vm2, %v363_v5  ;;  %p787_p11 = pnand %p786_p8, %p1088_p3  ;;  %s789_s7 = sshll.u32 %s862_s8, 4  ;;  %s790_s7 = int_to_ptr.vmem [resolvable:$false] %s789_s7 }
  0x51   : > { %664 = vmatmul.mubr.msk.f32.vlgmr.msra.gmra.mxu1 %vm209_vm2, %v438_v6  ;;  %206 = vperm.xlu0 %730, %v202_v7   ;;  %s791_s9 = scalar_lea.vmem %s790_s7, 512  ;;  %p792_p10 = scmp.lt.s32.totalorder %s1017_s23, %s790_s7 }
  0x52   : > { %p788_p7 = pneg %p787_p11  ;;  %p793_p2 = scmp.lt.s32.totalorder %s791_s9, %s785_s4 }
  0x54   : > { %p794_p13 = por %p793_p2, %p792_p10 }
  0x56   : > { %p795_p0 = pnand %p794_p13, %p788_p7 }
  0xcc   : > { %v207_v8 = vpop.permute.xlu0 %206 }
 0x10c   : > { %v283_v9 = vpop.f32.mrf.mxu0 }
 0x10d   : > { %v358_v10 = vpop.f32.mrf.mxu1  ;;  %v284_v11 = vadd.f32 %v283_v9, %v207_v8 }
 0x10e   : > { %v359_v12 = vadd.f32 %v358_v10, %v207_v8  ;;  %v650_v13 = vpop.f32.mrf.mxu0 }
 0x10f   : > { %v655_v14 = vpop.f32.mrf.mxu1  ;;  %513 = vst.msk [vmem:[%s200_s22] sm:$0xf] %vm512_vm3, %v284_v11 }
 0x110   : > { %514 = vst.msk [vmem:[%s200_s22 + $0x4] sm:$0xf] %vm512_vm3, %v359_v12  ;;  %v433_v15 = vpop.f32.mrf.mxu0 }
 0x111   : > { %v508_v16 = vpop.f32.mrf.mxu1  ;;  %v434_v17 = vadd.f32 %v433_v15, %v207_v8 }
 0x112   : > { %v509_v18 = vadd.f32 %v508_v16, %v207_v8  ;;  %v660_v19 = vpop.f32.mrf.mxu0 }
 0x113   : > { %v665_v20 = vpop.f32.mrf.mxu1  ;;  %515 = vst.msk [vmem:[%s200_s22 + $0x8] sm:$0xf] %vm512_vm3, %v434_v17 }
 0x114   : > { %516 = vst.msk [vmem:[%s200_s22 + $0xc] sm:$0xf] %vm512_vm3, %v509_v18 }
 0x115   : > { %798 = shalt.err (!%p795_p0)
}
 0x116   : > { %s799_s10 = scalar_lea.hbm %s1024_s30, 256  ;;  %s803_s27 = scalar_lea.hbm %s1072_s3, 512 }
 0x117   : > { %p800_p5 = scmp.ne.s32.totalorder %s1024_s30, %s799_s10  ;;  %p804_p1 = scmp.lt.s32.totalorder %s1024_s30, %s1072_s3 }
 0x118   : > { %p805_p4 = scmp.lt.s32.totalorder %s803_s27, %s799_s10 }
 0x119   : > { %p801_p9 = pnand %p800_p5, %p1088_p3 }
 0x11a   : > { %p806_p6 = por %p805_p4, %p804_p1 }
 0x11b   : > { %p802_p12 = pneg %p801_p9 }
 0x11d   : > { %p807_p8 = pnand %p806_p6, %p802_p12 }
 0x11f   : > { %810 = shalt.err (!%p807_p8)
}
 0x120   : > { %s863_s17 = smov 64   ;;  %s864_s22 = smov 4  }
 0x121   : > { %672 = dma.vmem_to_hbm [thread:$0]  (%p1088_p3), %s1017_s23, 256, %s1024_s30, %s518_s16, %s863_s17, %s863_s17, %s864_s22  }
 0x122 PF: > { %s546_s25 = sand.u32 1, %s841_s12   ;;  %p1089_p11 = scmp.ne.s32.totalorder %s1078_s19, 0 }
 0x123   : > { %p1090_p7 = scmp.ge.s32.totalorder %s853_s15, 2  ;;  %s547_s28 = scalar_lea.sflag [#allocation4], %s546_s25 }
 0x125   : > { %p683_p10 = pnand %p1090_p7, %p1089_p11 }
 0x127   : > { %p684_p2 = pneg %p683_p10 }
 0x129   : > { %836 = dma.done.wait (%p684_p2), %s547_s28, 256  }
 0x12a   : > { %838 = vsyncadd (%p684_p2), %s547_s28, 4294967040  ;;  %p17_p13 = scmp.ge.s32.totalorder %s939_s24, 4   ;;  %s1091_s12 = smov %s845_s13 }
 0x12b   : > { %s1092_s13 = smov %s849_s14  ;;  %s1093_s14 = smov %s956_s5 }
 0x12c   : > { %s1094_s15 = smov %s939_s24  ;;  %19 = sbr.rel (!%p17_p13) target bundleno = 6 (0x6), region = 84 }
 0x131   :  { %552 = vsyncpa [#allocation3], 1 }
 0x132   :  { %554 = vsyncpa [#allocation3 + $0x1], 1 }
 0x133   :  { %555 = vsyncpa [#allocation6], 1 }
 0x134   :  { %556 = vsyncpa [#allocation4], 1 }
 0x135   :  { %558 = vsyncpa [#allocation4 + $0x1], 1 }

</bundles_post_ra>
